<compile_context>
chip_gen: v6e
topology: v6e:2x2x1
jax: 0.10.0
libtpu: 0.0.40
codegen_flags: <defaults>
</compile_context>

<pallas_src>
import functools

import jax
import jax.numpy as jnp
from jax import lax
from jax.experimental import pallas as pl
from jax.experimental.pallas import tpu as pltpu


def _fused_gate_kernel(x_ref, keff_ref, bg_ref, wexp_ref, bexp_ref,
                       out_ref, ew_ref, *, bb, C, E, Co):
    """Fused gate-conv-sum + softmax/top-1 + routed-expert matmul, per batch block.

    x_ref:    (bb, C, HW)  lane-dense activations (NCHW, spatial flattened)
    keff_ref: (E, C, HW)   effective per-pixel gating weights (3x3 conv folded),
                           lane-dense over HW
    bg_ref:   (1, E)       gating bias, pre-scaled by Ho*Wo
    wexp_ref: (E, Co, C)   expert 1x1-conv weights (pre-transposed)
    bexp_ref: (E, Co, 1)   expert biases
    out_ref:  (bb, Co, HW) combined output (lane-dense)
    ew_ref:   (bb, E)      combine weights (top-1 softmax prob, scattered)
    """
    x = x_ref[...]                                          # (bb, C, HW)  f32
    keff = keff_ref[...]                                    # (E,  C, HW)  f32

    # --- gate logits: sum_{h,w} conv3x3(x)[e] == <x[b], keff[e]> + Ho*Wo*bg[e]
    # All-VPU: broadcast multiply + two last-axis reduces (no MXU round trips).
    prod = x[:, None, :, :] * keff[None, :, :, :]           # (bb, E, C, HW)
    gate = jnp.sum(jnp.sum(prod, axis=-1), axis=-1)         # (bb, E)
    gate = gate + bg_ref[...]                               # (bb, E)

    # --- softmax + top-1 (E tiny, all in vregs) ----------------------------
    m = jnp.max(gate, axis=1, keepdims=True)                # (bb, 1)
    z = jnp.sum(jnp.exp(gate - m), axis=1, keepdims=True)   # (bb, 1)
    top1 = 1.0 / z                                          # max softmax prob
    iota = lax.broadcasted_iota(jnp.int32, (bb, E), 1)
    first = jnp.min(jnp.where(gate >= m, iota, E), axis=1, keepdims=True)
    gsel = jnp.where(iota == first, top1, 0.0)              # top1 * onehot
    ew_ref[...] = gsel                                      # combine weights

    # --- per-row routed expert: top1-scaled weight select + one matmul ------
    # bb and E are tiny compile-time ints; loops unroll statically.
    for r in range(bb):
        w_sel = jnp.zeros((Co, C), dtype=jnp.float32)
        b_sel = jnp.zeros((Co, 1), dtype=jnp.float32)
        for e in range(E):
            g = gsel[r:r + 1, e:e + 1]                      # (1,1), already *top1
            w_sel = w_sel + g * wexp_ref[e]
            b_sel = b_sel + g * bexp_ref[e]
        y = jnp.dot(w_sel, x[r], preferred_element_type=jnp.float32)  # (Co, HW)
        out_ref[r] = y + b_sel


def preprocess_params(params, H, W):
    """One-time host-side folding of the 3x3 gating conv + expert layouts.

    Call once per parameter set; the result is reused across forward calls.
    """
    Wg, bg = params["Wg"], params["bg"]          # (E, C, 3, 3), (E,)
    Wexp, bexp = params["Wexp"], params["bexp"]  # (E, C, Co),  (E, Co)
    E, C = Wg.shape[0], Wg.shape[1]
    Co = Wexp.shape[-1]
    Ho, Wo = H - 2, W - 2

    # Fold the 3x3 VALID conv + full spatial sum into per-pixel effective
    # gating weights:  gate[b,e] = sum_{c,p} x[b,c,p]*keff[e,c,p] + Ho*Wo*bg[e]
    hh = jnp.arange(H)[:, None]
    dh = jnp.arange(3)[None, :]
    cover_h = ((dh <= hh) & (dh >= hh - (Ho - 1))).astype(jnp.float32)  # (H,3)
    ww = jnp.arange(W)[:, None]
    dw = jnp.arange(3)[None, :]
    cover_w = ((dw <= ww) & (dw >= ww - (Wo - 1))).astype(jnp.float32)  # (W,3)
    keff = jnp.einsum("ecij,hi,wj->echw", Wg.astype(jnp.float32),
                      cover_h, cover_w).reshape(E, C, H * W)   # lane-dense HW

    return {
        "keff": keff,                                                    # (E, C, HW)
        "bg_scaled": (float(Ho * Wo) * bg).reshape(1, E).astype(jnp.float32),
        "wexp_t": jnp.transpose(Wexp, (0, 2, 1)).astype(jnp.float32),   # (E, Co, C)
        "bexp_r": bexp.reshape(E, Co, 1).astype(jnp.float32),           # (E, Co, 1)
    }


def topk_nonlinear_mix_gate(x_nchw, prep, block_b=None):
    """Eval-mode forward.  `prep` comes from preprocess_params()."""
    B, C, H, W = x_nchw.shape
    HW = H * W
    keff = prep["keff"]
    E = keff.shape[0]
    wexp_t = prep["wexp_t"]
    Co = wexp_t.shape[1]

    # Batch blocking: collapse small batches into a single grid step
    # (single-TC v5e/v6e); for v7x pass block_b = B // 2 to shard both cores.
    if block_b is None:
        if B <= 8:
            block_b = B
        else:
            block_b = next(b for b in (8, 4, 2, 1) if B % b == 0)
    assert B % block_b == 0
    grid_b = B // block_b

    # NCHW-native flattening: pure reshape, no transpose of x on the hot path.
    x_flat = x_nchw.reshape(B, C, HW).astype(jnp.float32)            # (B, C, HW)

    cost = pl.CostEstimate(
        flops=2 * B * C * HW * (E + Co),
        transcendentals=B * E,
        bytes_accessed=4 * (B * C * HW + E * C * HW + E + E * Co * C
                            + E * Co + B * Co * HW + B * E),
    )

    out_flat, ew = pl.pallas_call(
        functools.partial(_fused_gate_kernel, bb=block_b, C=C, E=E, Co=Co),
        out_shape=(
            jax.ShapeDtypeStruct((B, Co, HW), jnp.float32),
            jax.ShapeDtypeStruct((B, E), jnp.float32),
        ),
        grid=(grid_b,),
        in_specs=[
            pl.BlockSpec((block_b, C, HW), lambda b: (b, 0, 0)),
            pl.BlockSpec((E, C, HW), lambda b: (0, 0, 0)),
            pl.BlockSpec((1, E), lambda b: (0, 0)),
            pl.BlockSpec((E, Co, C), lambda b: (0, 0, 0)),
            pl.BlockSpec((E, Co, 1), lambda b: (0, 0, 0)),
        ],
        out_specs=(
            pl.BlockSpec((block_b, Co, HW), lambda b: (b, 0, 0)),
            pl.BlockSpec((block_b, E), lambda b: (b, 0)),
        ),
        compiler_params=pltpu.CompilerParams(dimension_semantics=("parallel",)),
        cost_estimate=cost,
    )(x_flat, keff, prep["bg_scaled"], wexp_t, prep["bexp_r"])

    output = out_flat.reshape(B, Co, H, W)                  # NCHW
    return output, ew


def reference_forward(x_nchw, params):
    """Pure-JAX reference of the eval-mode PyTorch forward."""
    Wg, bg, Wexp, bexp = params["Wg"], params["bg"], params["Wexp"], params["bexp"]
    B, C, H, W = x_nchw.shape
    E, _, Co = Wexp.shape
    conv = jax.lax.conv_general_dilated(
        x_nchw, Wg, window_strides=(1, 1), padding="VALID",
        dimension_numbers=("NCHW", "OIHW", "NCHW"))
    gate = jnp.sum(conv + bg[None, :, None, None], axis=(2, 3))      # (B, E)
    probs = jax.nn.softmax(gate, axis=1)
    top1_idx = jnp.argmax(probs, axis=1)
    top1_val = jnp.max(probs, axis=1)
    one_hot = jax.nn.one_hot(top1_idx, E, dtype=jnp.float32)
    ew = top1_val[:, None] * one_hot
    d = (ew != 0.0).astype(jnp.float32)
    out = jnp.zeros((B, Co, H, W), jnp.float32)
    for e in range(E):
        masked = x_nchw * d[:, e][:, None, None, None]
        y = jnp.einsum("bchw,co->bohw", masked, Wexp[e]) \
            + bexp[e][None, :, None, None]
        out = out + ew[:, e][:, None, None, None] * y
    return out, ew


if __name__ == "__main__":
    B, C, H, W = 2, 4, 16, 16   # x: NCHW, input_size = C
    E = 4                       # num_experts
    Co = 8                      # per-expert output channels (1x1-conv experts)

    key = jax.random.PRNGKey(0)
    kx, k0, k1, k2, k3 = jax.random.split(key, 5)
    x = jax.random.normal(kx, (B, C, H, W), dtype=jnp.float32)
    params = {
        "Wg": 0.1 * jax.random.normal(k0, (E, C, 3, 3), dtype=jnp.float32),
        "bg": 0.1 * jax.random.normal(k1, (E,), dtype=jnp.float32),
        "Wexp": 0.1 * jax.random.normal(k2, (E, C, Co), dtype=jnp.float32),
        "bexp": 0.1 * jax.random.normal(k3, (E, Co), dtype=jnp.float32),
    }

    # Hoisted: parameter preprocessing happens once, off the per-call hot path.
    prep = jax.tree_util.tree_map(jax.block_until_ready,
                                  preprocess_params(params, H, W))

    out, ew = topk_nonlinear_mix_gate(x, prep)
    jax.block_until_ready((out, ew))

    ref_out, ref_ew = reference_forward(x, params)
    assert out.shape == (B, Co, H, W) and ew.shape == (B, E)
    assert jnp.allclose(out, ref_out, rtol=1e-3, atol=1e-3), "output mismatch"
    assert jnp.allclose(ew, ref_ew, rtol=1e-3, atol=1e-3), "expert_weights mismatch"

    print("KERNEL_OK")
</pallas_src>

<mosaic_0001>
module attributes {stable_mosaic.version = 11 : i64} {
  func.func @_fused_gate_kernel(%arg0: i32, %arg1: memref<2x4x256xf32, #tpu.memory_space<vmem>>, %arg2: memref<4x4x256xf32, #tpu.memory_space<vmem>>, %arg3: memref<1x4xf32, #tpu.memory_space<vmem>>, %arg4: memref<4x8x4xf32, #tpu.memory_space<vmem>>, %arg5: memref<4x8x1xf32, #tpu.memory_space<vmem>>, %arg6: memref<2x8x256xf32, #tpu.memory_space<vmem>>, %arg7: memref<2x4xf32, #tpu.memory_space<vmem>>) attributes {dimension_semantics = [#tpu.dimension_semantics<parallel>], iteration_bounds = array<i64: 1>, scalar_prefetch = 0 : i64, scratch_operands = 0 : i64, tpu.core_type = #tpu.core_type<tc>, window_params = [{transform_indices = @transform_0, window_bounds = array<i64: 2, 4, 256>}, {pipeline_mode = #tpu.pipeline_mode<synchronous>, transform_indices = @transform_1, window_bounds = array<i64: 4, 4, 256>}, {pipeline_mode = #tpu.pipeline_mode<synchronous>, transform_indices = @transform_2, window_bounds = array<i64: 1, 4>}, {pipeline_mode = #tpu.pipeline_mode<synchronous>, transform_indices = @transform_3, window_bounds = array<i64: 4, 8, 4>}, {pipeline_mode = #tpu.pipeline_mode<synchronous>, transform_indices = @transform_4, window_bounds = array<i64: 4, 8, 1>}, {transform_indices = @transform_5, window_bounds = array<i64: 2, 8, 256>}, {transform_indices = @transform_6, window_bounds = array<i64: 2, 4>}]} {
    %c0 = arith.constant 0 : index
    %c0_0 = arith.constant 0 : index
    %c0_1 = arith.constant 0 : index
    %0 = vector.load %arg1[%c0, %c0_0, %c0_1] : memref<2x4x256xf32, #tpu.memory_space<vmem>>, vector<2x4x256xf32>
    %c0_2 = arith.constant 0 : index
    %c0_3 = arith.constant 0 : index
    %c0_4 = arith.constant 0 : index
    %1 = vector.load %arg2[%c0_2, %c0_3, %c0_4] : memref<4x4x256xf32, #tpu.memory_space<vmem>>, vector<4x4x256xf32>
    %2 = vector.shape_cast %0 : vector<2x4x256xf32> to vector<2x1x4x256xf32>
    %3 = vector.shape_cast %1 : vector<4x4x256xf32> to vector<1x4x4x256xf32>
    %4 = vector.broadcast %2 : vector<2x1x4x256xf32> to vector<2x4x4x256xf32>
    %5 = vector.broadcast %3 : vector<1x4x4x256xf32> to vector<2x4x4x256xf32>
    %6 = arith.mulf %4, %5 : vector<2x4x4x256xf32>
    %cst = arith.constant dense<0.000000e+00> : vector<2x4x4xf32>
    %7 = vector.multi_reduction <add>, %6, %cst [3] : vector<2x4x4x256xf32> to vector<2x4x4xf32>
    %cst_5 = arith.constant dense<0.000000e+00> : vector<2x4xf32>
    %8 = vector.multi_reduction <add>, %7, %cst_5 [2] : vector<2x4x4xf32> to vector<2x4xf32>
    %c0_6 = arith.constant 0 : index
    %c0_7 = arith.constant 0 : index
    %9 = vector.load %arg3[%c0_6, %c0_7] : memref<1x4xf32, #tpu.memory_space<vmem>>, vector<1x4xf32>
    %10 = vector.broadcast %9 : vector<1x4xf32> to vector<2x4xf32>
    %11 = arith.addf %8, %10 : vector<2x4xf32>
    %cst_8 = arith.constant dense<0xFF800000> : vector<2xf32>
    %12 = vector.multi_reduction <maximumf>, %11, %cst_8 [1] : vector<2x4xf32> to vector<2xf32>
    %13 = vector.shape_cast %12 : vector<2xf32> to vector<2x1xf32>
    %14 = vector.broadcast %13 : vector<2x1xf32> to vector<2x4xf32>
    %15 = arith.subf %11, %14 : vector<2x4xf32>
    %16 = math.exp %15 : vector<2x4xf32>
    %cst_9 = arith.constant dense<0.000000e+00> : vector<2xf32>
    %17 = vector.multi_reduction <add>, %16, %cst_9 [1] : vector<2x4xf32> to vector<2xf32>
    %18 = vector.shape_cast %17 : vector<2xf32> to vector<2x1xf32>
    %cst_10 = arith.constant 1.000000e+00 : f32
    %19 = vector.broadcast %cst_10 : f32 to vector<2x1xf32>
    %20 = arith.divf %19, %18 : vector<2x1xf32>
    %21 = tpu.iota {dimensions = array<i32: 1>} : vector<2x4xi32>
    %22 = vector.broadcast %13 : vector<2x1xf32> to vector<2x4xf32>
    %23 = arith.cmpf oge, %11, %22 : vector<2x4xf32>
    %c4_i32 = arith.constant 4 : i32
    %24 = vector.broadcast %c4_i32 : i32 to vector<2x4xi32>
    %25 = arith.select %23, %21, %24 : vector<2x4xi1>, vector<2x4xi32>
    %cst_11 = arith.constant dense<2147483647> : vector<2xi32>
    %26 = vector.multi_reduction <minsi>, %25, %cst_11 [1] : vector<2x4xi32> to vector<2xi32>
    %27 = vector.shape_cast %26 : vector<2xi32> to vector<2x1xi32>
    %28 = vector.broadcast %27 : vector<2x1xi32> to vector<2x4xi32>
    %29 = arith.cmpi eq, %21, %28 : vector<2x4xi32>
    %cst_12 = arith.constant 0.000000e+00 : f32
    %30 = vector.shape_cast %20 : vector<2x1xf32> to vector<2x1xf32>
    %31 = vector.broadcast %30 : vector<2x1xf32> to vector<2x4xf32>
    %32 = vector.broadcast %cst_12 : f32 to vector<2x4xf32>
    %33 = arith.select %29, %31, %32 : vector<2x4xi1>, vector<2x4xf32>
    %c0_13 = arith.constant 0 : index
    %c0_14 = arith.constant 0 : index
    %34 = vector.load %arg7[%c0_13, %c0_14] : memref<2x4xf32, #tpu.memory_space<vmem>>, vector<2x4xf32>
    tpu.vector_store %arg7[%c0_13, %c0_14], %33 {strides = array<i32>} : memref<2x4xf32, #tpu.memory_space<vmem>>, vector<2x4xf32>,
    %cst_15 = arith.constant 0.000000e+00 : f32
    %35 = vector.broadcast %cst_15 : f32 to vector<8x4xf32>
    %cst_16 = arith.constant 0.000000e+00 : f32
    %36 = vector.broadcast %cst_16 : f32 to vector<8x1xf32>
    %37 = vector.extract_strided_slice %33 {offsets = [0, 0], sizes = [1, 1], strides = [1, 1]} : vector<2x4xf32> to vector<1x1xf32>
    %c0_17 = arith.constant 0 : index
    %c0_18 = arith.constant 0 : index
    %c0_19 = arith.constant 0 : index
    %38 = vector.load %arg4[%c0_17, %c0_18, %c0_19] : memref<4x8x4xf32, #tpu.memory_space<vmem>>, vector<1x8x4xf32>
    %39 = vector.shape_cast %38 : vector<1x8x4xf32> to vector<8x4xf32>
    %40 = vector.broadcast %37 : vector<1x1xf32> to vector<8x4xf32>
    %41 = arith.mulf %40, %39 : vector<8x4xf32>
    %42 = arith.addf %35, %41 : vector<8x4xf32>
    %c0_20 = arith.constant 0 : index
    %c0_21 = arith.constant 0 : index
    %c0_22 = arith.constant 0 : index
    %43 = vector.load %arg5[%c0_20, %c0_21, %c0_22] : memref<4x8x1xf32, #tpu.memory_space<vmem>>, vector<1x8x1xf32>
    %44 = vector.shape_cast %43 : vector<1x8x1xf32> to vector<8x1xf32>
    %45 = vector.broadcast %37 : vector<1x1xf32> to vector<8x1xf32>
    %46 = arith.mulf %45, %44 : vector<8x1xf32>
    %47 = arith.addf %36, %46 : vector<8x1xf32>
    %48 = vector.extract_strided_slice %33 {offsets = [0, 1], sizes = [1, 1], strides = [1, 1]} : vector<2x4xf32> to vector<1x1xf32>
    %c1 = arith.constant 1 : index
    %c0_23 = arith.constant 0 : index
    %c0_24 = arith.constant 0 : index
    %49 = vector.load %arg4[%c1, %c0_23, %c0_24] : memref<4x8x4xf32, #tpu.memory_space<vmem>>, vector<1x8x4xf32>
    %50 = vector.shape_cast %49 : vector<1x8x4xf32> to vector<8x4xf32>
    %51 = vector.broadcast %48 : vector<1x1xf32> to vector<8x4xf32>
    %52 = arith.mulf %51, %50 : vector<8x4xf32>
    %53 = arith.addf %42, %52 : vector<8x4xf32>
    %c1_25 = arith.constant 1 : index
    %c0_26 = arith.constant 0 : index
    %c0_27 = arith.constant 0 : index
    %54 = vector.load %arg5[%c1_25, %c0_26, %c0_27] : memref<4x8x1xf32, #tpu.memory_space<vmem>>, vector<1x8x1xf32>
    %55 = vector.shape_cast %54 : vector<1x8x1xf32> to vector<8x1xf32>
    %56 = vector.broadcast %48 : vector<1x1xf32> to vector<8x1xf32>
    %57 = arith.mulf %56, %55 : vector<8x1xf32>
    %58 = arith.addf %47, %57 : vector<8x1xf32>
    %59 = vector.extract_strided_slice %33 {offsets = [0, 2], sizes = [1, 1], strides = [1, 1]} : vector<2x4xf32> to vector<1x1xf32>
    %c2 = arith.constant 2 : index
    %c0_28 = arith.constant 0 : index
    %c0_29 = arith.constant 0 : index
    %60 = vector.load %arg4[%c2, %c0_28, %c0_29] : memref<4x8x4xf32, #tpu.memory_space<vmem>>, vector<1x8x4xf32>
    %61 = vector.shape_cast %60 : vector<1x8x4xf32> to vector<8x4xf32>
    %62 = vector.broadcast %59 : vector<1x1xf32> to vector<8x4xf32>
    %63 = arith.mulf %62, %61 : vector<8x4xf32>
    %64 = arith.addf %53, %63 : vector<8x4xf32>
    %c2_30 = arith.constant 2 : index
    %c0_31 = arith.constant 0 : index
    %c0_32 = arith.constant 0 : index
    %65 = vector.load %arg5[%c2_30, %c0_31, %c0_32] : memref<4x8x1xf32, #tpu.memory_space<vmem>>, vector<1x8x1xf32>
    %66 = vector.shape_cast %65 : vector<1x8x1xf32> to vector<8x1xf32>
    %67 = vector.broadcast %59 : vector<1x1xf32> to vector<8x1xf32>
    %68 = arith.mulf %67, %66 : vector<8x1xf32>
    %69 = arith.addf %58, %68 : vector<8x1xf32>
    %70 = vector.extract_strided_slice %33 {offsets = [0, 3], sizes = [1, 1], strides = [1, 1]} : vector<2x4xf32> to vector<1x1xf32>
    %c3 = arith.constant 3 : index
    %c0_33 = arith.constant 0 : index
    %c0_34 = arith.constant 0 : index
    %71 = vector.load %arg4[%c3, %c0_33, %c0_34] : memref<4x8x4xf32, #tpu.memory_space<vmem>>, vector<1x8x4xf32>
    %72 = vector.shape_cast %71 : vector<1x8x4xf32> to vector<8x4xf32>
    %73 = vector.broadcast %70 : vector<1x1xf32> to vector<8x4xf32>
    %74 = arith.mulf %73, %72 : vector<8x4xf32>
    %75 = arith.addf %64, %74 : vector<8x4xf32>
    %c3_35 = arith.constant 3 : index
    %c0_36 = arith.constant 0 : index
    %c0_37 = arith.constant 0 : index
    %76 = vector.load %arg5[%c3_35, %c0_36, %c0_37] : memref<4x8x1xf32, #tpu.memory_space<vmem>>, vector<1x8x1xf32>
    %77 = vector.shape_cast %76 : vector<1x8x1xf32> to vector<8x1xf32>
    %78 = vector.broadcast %70 : vector<1x1xf32> to vector<8x1xf32>
    %79 = arith.mulf %78, %77 : vector<8x1xf32>
    %80 = arith.addf %69, %79 : vector<8x1xf32>
    %81 = vector.extract_strided_slice %0 {offsets = [0, 0, 0], sizes = [1, 4, 256], strides = [1, 1, 1]} : vector<2x4x256xf32> to vector<1x4x256xf32>
    %82 = vector.shape_cast %81 : vector<1x4x256xf32> to vector<4x256xf32>
    %cst_38 = arith.constant dense<0.000000e+00> : vector<8x256xf32>
    %83 = tpu.matmul %75, %82, %cst_38 {dimension_numbers = #tpu.dot_dimension_numbers<[1], [0], [0], [1], [0, 0, 1, 1], [], []>} : vector<8x4xf32>, vector<4x256xf32>, vector<8x256xf32> -> vector<8x256xf32>
    %84 = vector.broadcast %80 : vector<8x1xf32> to vector<8x256xf32>
    %85 = arith.addf %83, %84 : vector<8x256xf32>
    %c0_39 = arith.constant 0 : index
    %c0_40 = arith.constant 0 : index
    %c0_41 = arith.constant 0 : index
    %86 = vector.load %arg6[%c0_39, %c0_40, %c0_41] : memref<2x8x256xf32, #tpu.memory_space<vmem>>, vector<1x8x256xf32>
    %87 = vector.shape_cast %86 : vector<1x8x256xf32> to vector<8x256xf32>
    %88 = vector.shape_cast %85 : vector<8x256xf32> to vector<1x8x256xf32>
    tpu.vector_store %arg6[%c0_39, %c0_40, %c0_41], %88 {strides = array<i32>} : memref<2x8x256xf32, #tpu.memory_space<vmem>>, vector<1x8x256xf32>,
    %cst_42 = arith.constant 0.000000e+00 : f32
    %89 = vector.broadcast %cst_42 : f32 to vector<8x4xf32>
    %cst_43 = arith.constant 0.000000e+00 : f32
    %90 = vector.broadcast %cst_43 : f32 to vector<8x1xf32>
    %91 = vector.extract_strided_slice %33 {offsets = [1, 0], sizes = [1, 1], strides = [1, 1]} : vector<2x4xf32> to vector<1x1xf32>
    %c0_44 = arith.constant 0 : index
    %c0_45 = arith.constant 0 : index
    %c0_46 = arith.constant 0 : index
    %92 = vector.load %arg4[%c0_44, %c0_45, %c0_46] : memref<4x8x4xf32, #tpu.memory_space<vmem>>, vector<1x8x4xf32>
    %93 = vector.shape_cast %92 : vector<1x8x4xf32> to vector<8x4xf32>
    %94 = vector.broadcast %91 : vector<1x1xf32> to vector<8x4xf32>
    %95 = arith.mulf %94, %93 : vector<8x4xf32>
    %96 = arith.addf %89, %95 : vector<8x4xf32>
    %c0_47 = arith.constant 0 : index
    %c0_48 = arith.constant 0 : index
    %c0_49 = arith.constant 0 : index
    %97 = vector.load %arg5[%c0_47, %c0_48, %c0_49] : memref<4x8x1xf32, #tpu.memory_space<vmem>>, vector<1x8x1xf32>
    %98 = vector.shape_cast %97 : vector<1x8x1xf32> to vector<8x1xf32>
    %99 = vector.broadcast %91 : vector<1x1xf32> to vector<8x1xf32>
    %100 = arith.mulf %99, %98 : vector<8x1xf32>
    %101 = arith.addf %90, %100 : vector<8x1xf32>
    %102 = vector.extract_strided_slice %33 {offsets = [1, 1], sizes = [1, 1], strides = [1, 1]} : vector<2x4xf32> to vector<1x1xf32>
    %c1_50 = arith.constant 1 : index
    %c0_51 = arith.constant 0 : index
    %c0_52 = arith.constant 0 : index
    %103 = vector.load %arg4[%c1_50, %c0_51, %c0_52] : memref<4x8x4xf32, #tpu.memory_space<vmem>>, vector<1x8x4xf32>
    %104 = vector.shape_cast %103 : vector<1x8x4xf32> to vector<8x4xf32>
    %105 = vector.broadcast %102 : vector<1x1xf32> to vector<8x4xf32>
    %106 = arith.mulf %105, %104 : vector<8x4xf32>
    %107 = arith.addf %96, %106 : vector<8x4xf32>
    %c1_53 = arith.constant 1 : index
    %c0_54 = arith.constant 0 : index
    %c0_55 = arith.constant 0 : index
    %108 = vector.load %arg5[%c1_53, %c0_54, %c0_55] : memref<4x8x1xf32, #tpu.memory_space<vmem>>, vector<1x8x1xf32>
    %109 = vector.shape_cast %108 : vector<1x8x1xf32> to vector<8x1xf32>
    %110 = vector.broadcast %102 : vector<1x1xf32> to vector<8x1xf32>
    %111 = arith.mulf %110, %109 : vector<8x1xf32>
    %112 = arith.addf %101, %111 : vector<8x1xf32>
    %113 = vector.extract_strided_slice %33 {offsets = [1, 2], sizes = [1, 1], strides = [1, 1]} : vector<2x4xf32> to vector<1x1xf32>
    %c2_56 = arith.constant 2 : index
    %c0_57 = arith.constant 0 : index
    %c0_58 = arith.constant 0 : index
    %114 = vector.load %arg4[%c2_56, %c0_57, %c0_58] : memref<4x8x4xf32, #tpu.memory_space<vmem>>, vector<1x8x4xf32>
    %115 = vector.shape_cast %114 : vector<1x8x4xf32> to vector<8x4xf32>
    %116 = vector.broadcast %113 : vector<1x1xf32> to vector<8x4xf32>
    %117 = arith.mulf %116, %115 : vector<8x4xf32>
    %118 = arith.addf %107, %117 : vector<8x4xf32>
    %c2_59 = arith.constant 2 : index
    %c0_60 = arith.constant 0 : index
    %c0_61 = arith.constant 0 : index
    %119 = vector.load %arg5[%c2_59, %c0_60, %c0_61] : memref<4x8x1xf32, #tpu.memory_space<vmem>>, vector<1x8x1xf32>
    %120 = vector.shape_cast %119 : vector<1x8x1xf32> to vector<8x1xf32>
    %121 = vector.broadcast %113 : vector<1x1xf32> to vector<8x1xf32>
    %122 = arith.mulf %121, %120 : vector<8x1xf32>
    %123 = arith.addf %112, %122 : vector<8x1xf32>
    %124 = vector.extract_strided_slice %33 {offsets = [1, 3], sizes = [1, 1], strides = [1, 1]} : vector<2x4xf32> to vector<1x1xf32>
    %c3_62 = arith.constant 3 : index
    %c0_63 = arith.constant 0 : index
    %c0_64 = arith.constant 0 : index
    %125 = vector.load %arg4[%c3_62, %c0_63, %c0_64] : memref<4x8x4xf32, #tpu.memory_space<vmem>>, vector<1x8x4xf32>
    %126 = vector.shape_cast %125 : vector<1x8x4xf32> to vector<8x4xf32>
    %127 = vector.broadcast %124 : vector<1x1xf32> to vector<8x4xf32>
    %128 = arith.mulf %127, %126 : vector<8x4xf32>
    %129 = arith.addf %118, %128 : vector<8x4xf32>
    %c3_65 = arith.constant 3 : index
    %c0_66 = arith.constant 0 : index
    %c0_67 = arith.constant 0 : index
    %130 = vector.load %arg5[%c3_65, %c0_66, %c0_67] : memref<4x8x1xf32, #tpu.memory_space<vmem>>, vector<1x8x1xf32>
    %131 = vector.shape_cast %130 : vector<1x8x1xf32> to vector<8x1xf32>
    %132 = vector.broadcast %124 : vector<1x1xf32> to vector<8x1xf32>
    %133 = arith.mulf %132, %131 : vector<8x1xf32>
    %134 = arith.addf %123, %133 : vector<8x1xf32>
    %135 = vector.extract_strided_slice %0 {offsets = [1, 0, 0], sizes = [1, 4, 256], strides = [1, 1, 1]} : vector<2x4x256xf32> to vector<1x4x256xf32>
    %136 = vector.shape_cast %135 : vector<1x4x256xf32> to vector<4x256xf32>
    %cst_68 = arith.constant dense<0.000000e+00> : vector<8x256xf32>
    %137 = tpu.matmul %129, %136, %cst_68 {dimension_numbers = #tpu.dot_dimension_numbers<[1], [0], [0], [1], [0, 0, 1, 1], [], []>} : vector<8x4xf32>, vector<4x256xf32>, vector<8x256xf32> -> vector<8x256xf32>
    %138 = vector.broadcast %134 : vector<8x1xf32> to vector<8x256xf32>
    %139 = arith.addf %137, %138 : vector<8x256xf32>
    %c1_69 = arith.constant 1 : index
    %c0_70 = arith.constant 0 : index
    %c0_71 = arith.constant 0 : index
    %140 = vector.load %arg6[%c1_69, %c0_70, %c0_71] : memref<2x8x256xf32, #tpu.memory_space<vmem>>, vector<1x8x256xf32>
    %141 = vector.shape_cast %140 : vector<1x8x256xf32> to vector<8x256xf32>
    %142 = vector.shape_cast %139 : vector<8x256xf32> to vector<1x8x256xf32>
    tpu.vector_store %arg6[%c1_69, %c0_70, %c0_71], %142 {strides = array<i32>} : memref<2x8x256xf32, #tpu.memory_space<vmem>>, vector<1x8x256xf32>,
    return
  }
  func.func @transform_0(%arg0: i32) -> (i32, i32, i32) {
    %c0_i32 = arith.constant 0 : i32
    %c0_i32_0 = arith.constant 0 : i32
    %c0_i32_1 = arith.constant 0 : i32
    return %arg0, %c0_i32, %c0_i32_0 : i32, i32, i32
  }
  func.func @transform_1(%arg0: i32) -> (i32, i32, i32) {
    %c0_i32 = arith.constant 0 : i32
    %c0_i32_0 = arith.constant 0 : i32
    %c0_i32_1 = arith.constant 0 : i32
    %c0_i32_2 = arith.constant 0 : i32
    return %c0_i32, %c0_i32_0, %c0_i32_1 : i32, i32, i32
  }
  func.func @transform_2(%arg0: i32) -> (i32, i32) {
    %c0_i32 = arith.constant 0 : i32
    %c0_i32_0 = arith.constant 0 : i32
    %c0_i32_1 = arith.constant 0 : i32
    return %c0_i32, %c0_i32_0 : i32, i32
  }
  func.func @transform_3(%arg0: i32) -> (i32, i32, i32) {
    %c0_i32 = arith.constant 0 : i32
    %c0_i32_0 = arith.constant 0 : i32
    %c0_i32_1 = arith.constant 0 : i32
    %c0_i32_2 = arith.constant 0 : i32
    return %c0_i32, %c0_i32_0, %c0_i32_1 : i32, i32, i32
  }
  func.func @transform_4(%arg0: i32) -> (i32, i32, i32) {
    %c0_i32 = arith.constant 0 : i32
    %c0_i32_0 = arith.constant 0 : i32
    %c0_i32_1 = arith.constant 0 : i32
    %c0_i32_2 = arith.constant 0 : i32
    return %c0_i32, %c0_i32_0, %c0_i32_1 : i32, i32, i32
  }
  func.func @transform_5(%arg0: i32) -> (i32, i32, i32) {
    %c0_i32 = arith.constant 0 : i32
    %c0_i32_0 = arith.constant 0 : i32
    %c0_i32_1 = arith.constant 0 : i32
    return %arg0, %c0_i32, %c0_i32_0 : i32, i32, i32
  }
  func.func @transform_6(%arg0: i32) -> (i32, i32) {
    %c0_i32 = arith.constant 0 : i32
    %c0_i32_0 = arith.constant 0 : i32
    return %arg0, %c0_i32 : i32, i32
  }
}

</mosaic_0001>

<bundles_post_ra>
// kernel: tpu_custom_call.1
= control target key start
LH: loop header
LB: loop body
LE: loop exit
PB: predicated region body
PF: predicated region fallthrough
CT: control target
= control target key end

     0   :  { %12 = vsyncpa [#allocation3], 0  ;;  %vm62_vm0 = vcmask 1043456   ;;  %s929_s0 = inlined_call_operand.vmem [shape: f32[2,4,256], index: 0, kind: input, shape index: {}]   ;;  %s930_s1 = inlined_call_operand.vmem [shape: f32[4,4,256], index: 1, kind: input, shape index: {}]   ;;  %s931_s2 = inlined_call_operand.vmem [shape: f32[1,4], index: 2, kind: input, shape index: {}]   ;;  %s932_s3 = inlined_call_operand.vmem [shape: f32[4,8,4], index: 3, kind: input, shape index: {}]   ;;  %s933_s4 = inlined_call_operand.vmem [shape: f32[4,8,1], index: 4, kind: input, shape index: {}]   ;;  %s934_s5 = inlined_call_operand.hbm [shape: f32[2,8,256], index: 5, kind: output, shape index: {0}]   ;;  %s935_s6 = inlined_call_operand.hbm [shape: f32[2,4], index: 6, kind: output, shape index: {1}]  }
   0x1   :  { %v780_v0 = vld [vmem:[%s929_s0 + $0x8] sm:$0xff]  ;;  %v26_v1 = vld [vmem:[%s930_s1] sm:$0xff]  ;;  %v28_v6 = vld [vmem:[%s930_s1 + $0x10] sm:$0xff] }
   0x2   :  { %v788_v2 = vld [vmem:[%s929_s0] sm:$0xff]  ;;  %v34_v3 = vmul.f32 %v26_v1, %v780_v0  ;;  %v27_v5 = vld [vmem:[%s930_s1 + $0x8] sm:$0xff]  ;;  %v36_v9 = vmul.f32 %v28_v6, %v780_v0 }
   0x3   :  { %v30_v4 = vmul.f32 %v26_v1, %v788_v2  ;;  %v35_v7 = vmul.f32 %v27_v5, %v780_v0  ;;  %v31_v8 = vmul.f32 %v27_v5, %v788_v2  ;;  %v32_v10 = vmul.f32 %v28_v6, %v788_v2 }
   0x4   :  { %13 = vsyncpa [#allocation5], 0  ;;  %v50_v11 = vcombine.high %v34_v3, %v34_v3  ;;  %v83_v12 = vsel %vm62_vm0, %v34_v3, 0.0  ;;  %v52_v21 = vcombine.high %v36_v9, %v36_v9  ;;  %v29_v22 = vld [vmem:[%s930_s1 + $0x18] sm:$0xff]  ;;  %v93_v32 = vsel %vm62_vm0, %v36_v9, 0.0  ;;  %s732_s9 = smov 127  }
   0x5   :  { %v46_v13 = vcombine.high %v30_v4, %v30_v4  ;;  %v63_v14 = vsel %vm62_vm0, %v30_v4, 0.0  ;;  %v51_v15 = vcombine.high %v35_v7, %v35_v7  ;;  %v88_v16 = vsel %vm62_vm0, %v35_v7, 0.0  ;;  %s733_s12 = smov 1   ;;  %s734_s13 = smov 125  }
   0x6   :  { %v47_v17 = vcombine.high %v31_v8, %v31_v8  ;;  %v84_v18 = vsel %vm62_vm0, %v50_v11, 0.0  ;;  %v68_v20 = vsel %vm62_vm0, %v31_v8, 0.0  ;;  %v48_v28 = vcombine.high %v32_v10, %v32_v10  ;;  %s735_s16 = smov 2   ;;  %s736_s19 = smov 3  }
   0x7   :  { %v64_v19 = vsel %vm62_vm0, %v46_v13, 0.0  ;;  %v85_v23 = vadd.f32 %v84_v18, %v83_v12  ;;  %v89_v25 = vsel %vm62_vm0, %v51_v15, 0.0  ;;  %v37_v30 = vmul.f32 %v29_v22, %v780_v0  ;;  %v631_v13 = vld [vmem:[%s931_s2] ss:$0 sm:$0xff]  ;;  %s731_s2 = smov 126   ;;  %s738_s10 = smov [#allocation4]  }
   0x8   :  { %v65_v24 = vadd.f32 %v64_v19, %v63_v14  ;;  %v69_v26 = vsel %vm62_vm0, %v47_v17, 0.0  ;;  %v90_v27 = vadd.f32 %v89_v25, %v88_v16  ;;  %v33_v31 = vmul.f32 %v29_v22, %v788_v2  ;;  %s619_s11 = sshll.u32 %s738_s10, 4  ;;  %s620_s11 = int_to_ptr.vmem [resolvable:$true] %s619_s11 }
   0x9   :  { %86 = vadd.xlane.f32.xlu1 %v85_v23  ;;  %v70_v29 = vadd.f32 %v69_v26, %v68_v20  ;;  %v94_v33 = vsel %vm62_vm0, %v52_v21, 0.0  ;;  %v73_v34 = vsel %vm62_vm0, %v32_v10, 0.0  ;;  %v74_v35 = vsel %vm62_vm0, %v48_v28, 0.0  ;;  %p691_p1 = scmp.lt.s32.totalorder %s620_s11, %s620_s11 }
   0xa   :  { %66 = vadd.xlane.f32.xlu0 %v65_v24  ;;  %v53_v36 = vcombine.high %v37_v30, %v37_v30  ;;  %v49_v37 = vcombine.high %v33_v31, %v33_v31  ;;  %v95_v38 = vadd.f32 %v94_v33, %v93_v32  ;;  %v75_v39 = vadd.f32 %v74_v35, %v73_v34 }
   0xb   :  { %v98_v40 = vsel %vm62_vm0, %v37_v30, 0.0  ;;  %v78_v42 = vsel %vm62_vm0, %v33_v31, 0.0  ;;  %v111_v46 = vlaneseq  ;;  %vm145_vm1 = vcmask 1041409  }
   0xc   :  { %v99_v41 = vsel %vm62_vm0, %v53_v36, 0.0  ;;  %v79_v43 = vsel %vm62_vm0, %v49_v37, 0.0  ;;  %vm147_vm2 = vcmask 1042434   ;;  %vm149_vm3 = vcmask 1043459  }
   0xd   :  { %91 = vadd.xlane.f32.xlu1 %v90_v27  ;;  %v100_v44 = vadd.f32 %v99_v41, %v98_v40  ;;  %v80_v45 = vadd.f32 %v79_v43, %v78_v42  ;;  %v823_v49 = vand.u32 127, %v111_v46  ;;  %v825_v50 = vshrl.u32 %v111_v46, 7 }
   0xe   :  { %71 = vadd.xlane.f32.xlu0 %v70_v29  ;;  %vm156_vm4 = vcmask 27648   ;;  %v730_v12 = vmov 0   ;;  %vm193_vm5 = vcmask 25600   ;;  %vm361_vm10 = vcmask 31744  }
   0xf   :  { %v829_v53 = vsub.s32 %v823_v49, %v825_v50  ;;  %678 = vset.pattern.permute.xlu1 %v730_v12  ;;  %679 = vset.pattern.permute.xlu0 %v730_v12  ;;  %v200_v25 = vsub.s32 0, %v825_v50  ;;  %v204_v26 = vsub.s32 1, %v825_v50  ;;  %v632_v50 = vld [vmem:[%s932_s3 + $0x8] sm:$0xff] }
  0x11   :  { %96 = vadd.xlane.f32.xlu1 %v95_v38 }
  0x12   :  { %76 = vadd.xlane.f32.xlu0 %v75_v39 }
  0x15   :  { %101 = vadd.xlane.f32.xlu1 %v100_v44 }
  0x16   :  { %81 = vadd.xlane.f32.xlu0 %v80_v45 }
  0x92   :  { %v87_v47 = vpop.xlane.xlu1 %86 }
  0x93   :  { %v67_v48 = vpop.xlane.xlu0 %66  ;;  %v132_v54 = vrot.slane %v87_v47, %v829_v53 }
  0x94   :  { %v116_v61 = vrot.slane %v67_v48, %v829_v53 }
  0x96   :  { %v92_v51 = vpop.xlane.xlu1 %91 }
  0x97   :  { %v72_v52 = vpop.xlane.xlu0 %71  ;;  %v136_v55 = vrot.slane %v92_v51, %v829_v53 }
  0x98   :  { %v120_v58 = vrot.slane %v72_v52, %v829_v53 }
  0x99   :  { %v151_v62 = vsel %vm145_vm1, %v136_v55, %v132_v54 }
  0x9a   :  { %v97_v56 = vpop.xlane.xlu1 %96  ;;  %v146_v3 = vsel %vm145_vm1, %v120_v58, %v116_v61 }
  0x9b   :  { %v77_v57 = vpop.xlane.xlu0 %76  ;;  %v140_v59 = vrot.slane %v97_v56, %v829_v53 }
  0x9c   :  { %v124_v60 = vrot.slane %v77_v57, %v829_v53 }
  0x9d   :  { %v152_v6 = vsel %vm147_vm2, %v140_v59, %v151_v62 }
  0x9e   :  { %v102_v63 = vpop.xlane.xlu1 %101  ;;  %v148_v7 = vsel %vm147_vm2, %v124_v60, %v146_v3 }
  0x9f   :  { %v82_v1 = vpop.xlane.xlu0 %81  ;;  %v144_v4 = vrot.slane %v102_v63, %v829_v53 }
  0xa0   :  { %v128_v5 = vrot.slane %v82_v1, %v829_v53 }
  0xa1   :  { %v153_v8 = vsel %vm149_vm3, %v144_v4, %v152_v6 }
  0xa2   :  { %v150_v9 = vsel %vm149_vm3, %v128_v5, %v148_v7  ;;  %v160_v10 = vsel %vm156_vm4, %v153_v8, 0.0  ;;  %v642_v5 = vld [vmem:[%s933_s4 + $0x8] sm:$0xff]  ;;  %v646_v7 = vld [vmem:[%s933_s4 + $0x18] sm:$0xff]  ;;  %v360_v8 = vcombine.high %v788_v2, %v788_v2 }
  0xa3   :  { %v157_v11 = vsel %vm156_vm4, %v150_v9, 0.0  ;;  %161 = vadd.xlane.f32.xlu1 %v160_v10  ;;  %v737_v9 = vmov 0.0   ;;  %v519_v10 = vcombine.high %v780_v0, %v780_v0 }
  0xa4   :  { %158 = vadd.xlane.f32.xlu0 %v157_v11  ;;  %638 = vmatprep.subr.msk.mxu0 %vm62_vm0, %v360_v8 }
  0xa5   :  { %639 = vmatpush1.msk.msra.mxu0 %vm62_vm0, %v788_v2  ;;  %433 = vmatprep.mubr.f32.mxu0 %v737_v9 }
  0xa6   :  { %591 = vmatprep.mubr.f32.mxu1 %v737_v9  ;;  %647 = vmatprep.subr.msk.mxu1 %vm62_vm0, %v519_v10 }
  0xa7   :  { %648 = vmatpush1.msk.msra.mxu1 %vm62_vm0, %v780_v0 }
  0xba   :  { %170 = vbcast.lane.b32.xlu0 %v631_v13, 256 }
  0xbe   :  { %240 = vbcast.lane.b32.xlu0 %v823_v49, 256 }
 0x12c   :  { %v162_v17 = vpop.xlane.xlu1 %161 }
 0x12d   :  { %v159_v14 = vpop.xlane.xlu0 %158 }
 0x131   :  { %v171_v15 = vpop.permute.xlu0 %170 }
 0x132   :  { %v173_v16 = vadd.f32 %v171_v15, %v159_v14  ;;  %v174_v18 = vadd.f32 %v171_v15, %v162_v17 }
 0x134   :  { %178 = vperm.xlu1 %678, %v173_v16  }
 0x135   :  { %v241_v30 = vpop.permute.xlu0 %240 }
 0x138   :  { %181 = vperm.xlu1 %678, %v174_v18  }
 0x1af   :  { %v179_v19 = vpop.permute.xlu1 %178 }
 0x1b0   :  { %v186_v21 = vrot.slane %v179_v19, %v829_v53 }
 0x1b3   :  { %v182_v20 = vpop.permute.xlu1 %181 }
 0x1b4   :  { %v190_v22 = vrot.slane %v182_v20, %v829_v53 }
 0x1b6   :  { %v191_v23 = vsel %vm145_vm1, %v190_v22, %v186_v21 }
 0x1b7   :  { %v194_v24 = vsel %vm193_vm5, %v191_v23, -inf }
 0x1b8   :  { %195 = vmax.xlane.f32.xlu1 %v194_v24 }
 0x241   :  { %v196_v27 = vpop.xlane.xlu1 %195 }
 0x242   :  { %v201_v28 = vrot.slane %v196_v27, %v200_v25  ;;  %v205_v29 = vrot.slane %v196_v27, %v204_v26 }
 0x244   :  { %v208_v31 = vsub.f32 %v173_v16, %v201_v28  ;;  %v209_v32 = vsub.f32 %v174_v18, %v205_v29  ;;  %vm237_vm6 = vcmp.ge.f32.partialorder %v173_v16, %v201_v28  ;;  %vm238_vm7 = vcmp.ge.f32.partialorder %v174_v18, %v205_v29 }
 0x245   :  { %v242_v33 = vsel %vm237_vm6, %v241_v30, 4  ;;  %v243_v36 = vsel %vm238_vm7, %v241_v30, 4  ;;  %v277_v30 = vld [vmem:[%s932_s3] sm:$0xff] }
 0x246   :  { %v210_v34 = vmul.f32 1.442695, %v208_v31  ;;  %245 = vperm.xlu0 %679, %v242_v33   ;;  %v212_v35 = vmul.f32 1.442695, %v209_v32  ;;  %v634_v32 = vld [vmem:[%s932_s3 + $0x10] sm:$0xff] }
 0x248   :  { %680 = vpow2.f32 %v210_v34 }
 0x249   :  { %682 = vpow2.f32 %v212_v35 }
 0x24a   :  { %248 = vperm.xlu0 %679, %v243_v36   ;;  %v636_v36 = vld [vmem:[%s932_s3 + $0x18] sm:$0xff] }
 0x255   :  { %v681_v37 = vpop.eup %680 }
 0x256   :  { %217 = vperm.xlu0 %679, %v681_v37   ;;  %v683_v38 = vpop.eup %682 }
 0x25a   :  { %220 = vperm.xlu0 %679, %v683_v38  }
 0x2c1   :  { %v246_v39 = vpop.permute.xlu0 %245 }
 0x2c2   :  { %v253_v41 = vrot.slane %v246_v39, %v829_v53 }
 0x2c5   :  { %v249_v40 = vpop.permute.xlu0 %248 }
 0x2c6   :  { %v257_v42 = vrot.slane %v249_v40, %v829_v53 }
 0x2c8   :  { %v258_v43 = vsel %vm145_vm1, %v257_v42, %v253_v41 }
 0x2c9   :  { %v259_v44 = vsel %vm193_vm5, %v258_v43, 2147483647 }
 0x2ca   :  { %v261_v45 = vshra.s32 %v259_v44, 16  ;;  %v260_v56 = vand.u32 65535, %v259_v44 }
 0x2cc   :  { %v263_v46 = vcvt.s32.f32 %v261_v45  ;;  %v262_v58 = vcvt.s32.f32 %v260_v56 }
 0x2ce   :  { %264 = vmin.xlane.f32.xlu0 %v263_v46 }
 0x2d1   :  { %v218_v47 = vpop.permute.xlu0 %217 }
 0x2d2   :  { %v225_v51 = vrot.slane %v218_v47, %v829_v53 }
 0x2d5   :  { %v221_v48 = vpop.permute.xlu0 %220 }
 0x2d6   :  { %v229_v52 = vrot.slane %v221_v48, %v829_v53 }
 0x2d8   :  { %v230_v54 = vsel %vm145_vm1, %v229_v52, %v225_v51 }
 0x2d9   :  { %v232_v55 = vsel %vm193_vm5, %v230_v54, 0.0 }
 0x2da   :  { %233 = vadd.xlane.f32.xlu1 %v232_v55 }
 0x357   :  { %v265_v57 = vpop.xlane.xlu0 %264 }
 0x358   :  { %vm266_vm8 = vcmp.eq.f32.partialorder %v263_v46, %v265_v57  ;;  %v271_v61 = vcvt.f32.s32 %v265_v57  ;;  %v449_v57 = vld [vmem:[%s933_s4] sm:$0xff] }
 0x359   :  { %v267_v59 = vsel %vm266_vm8, %v262_v58, inf }
 0x35a   :  { %268 = vmin.xlane.f32.xlu1 %v267_v59  ;;  %v272_v63 = vshll.u32 %v271_v61, 16 }
 0x363   :  { %v234_v60 = vpop.xlane.xlu1 %233 }
 0x364   :  { %684 = vrcp.f32 %v234_v60 }
 0x371   :  { %v685_v4 = vpop.eup %684 }
 0x3e3   :  { %v269_v62 = vpop.xlane.xlu1 %268 }
 0x3e4   :  { %v270_v1 = vcvt.f32.s32 %v269_v62 }
 0x3e6   :  { %v273_v3 = vadd.s32 %v272_v63, %v270_v1 }
 0x3e8   :  { %vm274_vm9 = vcmp.eq.s32.totalorder %v823_v49, %v273_v3  ;;  %v644_v49 = vld [vmem:[%s933_s4 + $0x10] sm:$0xff]  ;;  %s686_s4 = scalar_lea.vmem %s620_s11, 32 }
 0x3e9   :  { %v275_v53 = vsel %vm274_vm9, %v685_v4, 0.0  ;;  %p687_p0 = scmp.ne.s32.totalorder %s620_s11, %s686_s4  ;;  %p692_p2 = scmp.lt.s32.totalorder %s686_s4, %s686_s4 }
 0x3ea   :  { %276 = vst.msk [vmem:[#allocation4] sm:$0x3] %vm193_vm5, %v275_v53  ;;  %314 = vrot.lane.b32.xlu0 %v275_v53, %s731_s2  ;;  %293 = vrot.lane.b32.xlu1 %v275_v53, %s732_s9  ;;  %v443_v6 = vrot.slane %v275_v53, 1  ;;  %v892_v13 = vrot.slane %v275_v53, %v204_v26  ;;  %v288_v22 = vrot.slane %v275_v53, %v200_v25 }
 0x3eb   :  { %650 = vpush %v275_v53  ;;  %p693_p3 = por %p692_p2, %p691_p1 }
 0x3ec   :  { %v454_v59 = vmul.f32 %v892_v13, %v449_v57  ;;  %v289_v4 = vmul.f32 %v449_v57, %v288_v22 }
 0x3ed   :  { %p694_p4 = pnand %p693_p3, %p687_p0 }
 0x3ee   :  { %466 = vrot.lane.b32.xlu0 %v642_v5, %s733_s12  ;;  %335 = vrot.lane.b32.xlu1 %v275_v53, %s734_s13 }
 0x3f2   :  { %485 = vrot.lane.b32.xlu0 %v644_v49, %s735_s16  ;;  %457 = vrot.lane.b32.xlu1 %v443_v6, %s732_s9 }
 0x3f6   :  { %504 = vrot.lane.b32.xlu0 %v646_v7, %s736_s19  ;;  %476 = vrot.lane.b32.xlu1 %v443_v6, %s731_s2 }
 0x3fa   :  { %495 = vrot.lane.b32.xlu1 %v443_v6, %s734_s13 }
 0x3fe   :  { %303 = vrot.lane.b32.xlu1 %v642_v5, %s733_s12 }
 0x402   :  { %324 = vrot.lane.b32.xlu1 %v644_v49, %s735_s16 }
 0x406   :  { %345 = vrot.lane.b32.xlu1 %v646_v7, %s736_s19 }
 0x41c   :  { %s651_s20 = spop %650 }
 0x41d   :  { %v280_v31 = vstv %s651_s20 }
 0x41e   :  { %v282_v33 = vmul.f32 %v280_v31, %v277_v30 }
 0x45c   :  { %v315_v11 = vpop.permute.xlu0 %314  ;;  %v294_v12 = vpop.permute.xlu1 %293 }
 0x45d   :  { %652 = vpush %v294_v12 }
 0x45e   :  { %654 = vpush %v315_v11 }
 0x460   :  { %v467_v2 = vpop.permute.xlu0 %466  ;;  %v336_v14 = vpop.permute.xlu1 %335 }
 0x461   :  { %v469_v15 = vmul.f32 %v467_v2, %v892_v13  ;;  %656 = vpush %v336_v14 }
 0x462   :  { %658 = vpush %v443_v6 }
 0x463   :  { %471 = vrot.lane.b32.xlu0 %v469_v15, %s732_s9 }
 0x464   :  { %v486_v16 = vpop.permute.xlu0 %485  ;;  %v458_v17 = vpop.permute.xlu1 %457 }
 0x465   :  { %v488_v0 = vmul.f32 %v486_v16, %v892_v13  ;;  %660 = vpush %v458_v17 }
 0x467   :  { %490 = vrot.lane.b32.xlu0 %v488_v0, %s731_s2 }
 0x468   :  { %v505_v18 = vpop.permute.xlu0 %504  ;;  %v477_v19 = vpop.permute.xlu1 %476 }
 0x469   :  { %v507_v20 = vmul.f32 %v505_v18, %v892_v13  ;;  %662 = vpush %v477_v19 }
 0x46b   :  { %509 = vrot.lane.b32.xlu0 %v507_v20, %s734_s13 }
 0x46c   :  { %v496_v21 = vpop.permute.xlu1 %495 }
 0x46d   :  { %664 = vpush %v496_v21 }
 0x470   :  { %v304_v23 = vpop.permute.xlu1 %303 }
 0x471   :  { %v306_v24 = vmul.f32 %v304_v23, %v288_v22 }
 0x473   :  { %308 = vrot.lane.b32.xlu1 %v306_v24, %s732_s9 }
 0x474   :  { %v325_v26 = vpop.permute.xlu1 %324 }
 0x475   :  { %v327_v27 = vmul.f32 %v325_v26, %v288_v22 }
 0x477   :  { %329 = vrot.lane.b32.xlu1 %v327_v27, %s731_s2 }
 0x478   :  { %v346_v28 = vpop.permute.xlu1 %345 }
 0x479   :  { %v348_v29 = vmul.f32 %v346_v28, %v288_v22 }
 0x47b   :  { %350 = vrot.lane.b32.xlu1 %v348_v29, %s734_s13 }
 0x48e   :  { %s653_s25 = spop %652 }
 0x48f   :  { %v296_v25 = vstv %s653_s25  ;;  %s655_s28 = spop %654 }
 0x490   :  { %v298_v34 = vmul.f32 %v632_v50, %v296_v25  ;;  %v317_v35 = vstv %s655_s28 }
 0x491   :  { %v319_v38 = vmul.f32 %v634_v32, %v317_v35 }
 0x492   :  { %v299_v37 = vadd.f32 %v298_v34, %v282_v33  ;;  %s657_s0 = spop %656 }
 0x493   :  { %v338_v39 = vstv %s657_s0  ;;  %s659_s7 = spop %658 }
 0x494   :  { %v320_v40 = vadd.f32 %v319_v38, %v299_v37  ;;  %v340_v41 = vmul.f32 %v636_v36, %v338_v39  ;;  %v445_v44 = vstv %s659_s7 }
 0x495   :  { %v447_v47 = vmul.f32 %v445_v44, %v277_v30 }
 0x496   :  { %v341_v42 = vadd.f32 %v340_v41, %v320_v40  ;;  %s661_s1 = spop %660 }
 0x497   :  { %v460_v43 = vstv %s661_s1 }
 0x498   :  { %640 = vmatmul.mubr.msk.f32.vlgmr.msra.gmra.mxu0 %vm361_vm10, %v341_v42  ;;  %v462_v45 = vmul.f32 %v632_v50, %v460_v43 }
 0x49a   :  { %s663_s8 = spop %662  ;;  %v463_v51 = vadd.f32 %v462_v45, %v447_v47 }
 0x49b   :  { %v479_v46 = vstv %s663_s8 }
 0x49c   :  { %v481_v48 = vmul.f32 %v634_v32, %v479_v46 }
 0x49e   :  { %s665_s3 = spop %664  ;;  %v482_v54 = vadd.f32 %v481_v48, %v463_v51 }
 0x49f   :  { %v498_v52 = vstv %s665_s3 }
 0x4a0   :  { %v500_v55 = vmul.f32 %v636_v36, %v498_v52 }
 0x4a2   :  { %v501_v56 = vadd.f32 %v500_v55, %v482_v54 }
 0x4a4   :  { %649 = vmatmul.mubr.msk.f32.vlgmr.msra.gmra.mxu1 %vm361_vm10, %v501_v56 }
 0x4d5   :  { %v472_v58 = vpop.permute.xlu0 %471 }
 0x4d6   :  { %v474_v61 = vadd.f32 %v472_v58, %v454_v59 }
 0x4d9   :  { %v491_v60 = vpop.permute.xlu0 %490 }
 0x4da   :  { %v493_v62 = vadd.f32 %v491_v60, %v474_v61 }
 0x4dd   :  { %v510_v63 = vpop.permute.xlu0 %509 }
 0x4de   :  { %v512_v1 = vadd.f32 %v510_v63, %v493_v62 }
 0x4e0   :  { %515 = vperm.xlu0 %679, %v512_v1  }
 0x4e5   :  { %v309_v3 = vpop.permute.xlu1 %308 }
 0x4e6   :  { %v311_v5 = vadd.f32 %v309_v3, %v289_v4 }
 0x4e9   :  { %v330_v53 = vpop.permute.xlu1 %329 }
 0x4ea   :  { %v332_v49 = vadd.f32 %v330_v53, %v311_v5 }
 0x4ed   :  { %v351_v6 = vpop.permute.xlu1 %350 }
 0x4ee   :  { %v353_v7 = vadd.f32 %v351_v6, %v332_v49 }
 0x4f0   :  { %356 = vperm.xlu1 %678, %v353_v7  }
 0x4f1   :  { %697 = shalt.err (!%p694_p4)
}
 0x4f2   :  { %622 = dma.vmem_to_hbm [thread:$0]  %s620_s11, 32, %s935_s6, [#allocation5]  }
 0x4f3   :  { %s739_s14 = smov [#allocation2]  }
 0x4f4   :  { %s606_s15 = sshll.u32 %s739_s14, 4  ;;  %s607_s15 = int_to_ptr.vmem [resolvable:$true] %s606_s15 }
 0x4f5   :  { %s706_s16 = scalar_lea.vmem %s607_s15, 512  ;;  %p711_p6 = scmp.lt.s32.totalorder %s607_s15, %s607_s15 }
 0x4f6   :  { %p707_p5 = scmp.ne.s32.totalorder %s607_s15, %s706_s16  ;;  %p712_p7 = scmp.lt.s32.totalorder %s706_s16, %s706_s16 }
 0x4f8   :  { %p713_p8 = por %p712_p7, %p711_p6 }
 0x4fa   :  { %p714_p9 = pnand %p713_p8, %p707_p5 }
 0x558   :  { %v435_v12 = vpop.f32.mrf.mxu0 }
 0x55a   :  { %v437_v2 = vpop.f32.mrf.mxu0 }
 0x55b   :  { %v516_v8 = vpop.permute.xlu0 %515 }
 0x564   :  { %v593_v9 = vpop.f32.mrf.mxu1 }
 0x565   :  { %v594_v10 = vadd.f32 %v593_v9, %v516_v8 }
 0x566   :  { %v595_v11 = vpop.f32.mrf.mxu1 }
 0x567   :  { %599 = vst [vmem:[#allocation2 + $0x10] sm:$0xff] %v594_v10  ;;  %v596_v13 = vadd.f32 %v595_v11, %v516_v8 }
 0x569   :  { %600 = vst [vmem:[#allocation2 + $0x18] sm:$0xff] %v596_v13 }
 0x56b   :  { %v357_v14 = vpop.permute.xlu1 %356 }
 0x56c   :  { %v436_v15 = vadd.f32 %v435_v12, %v357_v14  ;;  %v438_v16 = vadd.f32 %v437_v2, %v357_v14 }
 0x56e   :  { %440 = vst [vmem:[#allocation2] sm:$0xff] %v436_v15  ;;  %441 = vst [vmem:[#allocation2 + $0x8] sm:$0xff] %v438_v16 }
 0x56f   :  { %717 = shalt.err (!%p714_p9)
}
 0x570   :  { %s740_s6 = smov 256   ;;  %s741_s17 = smov 16  }
 0x571   :  { %612 = dma.vmem_to_hbm [thread:$0]  %s607_s15, 512, %s934_s5, [#allocation3], %s740_s6, %s740_s6, %s741_s17  }
 0x572   :  { %726 = dma.done.wait [#allocation3], 512  }
 0x573   :  { %727 = vsyncadd [#allocation3], 4294966784 }
 0x574   :  { %728 = dma.done.wait [#allocation5], 32  }
 0x575   :  { %729 = vsyncadd [#allocation5], 4294967264 }
 0x576   :  { %629 = vsyncpa [#allocation3], 1 }
 0x577   :  { %630 = vsyncpa [#allocation5], 1 }

</bundles_post_ra>
